<compile_context>
chip_gen: v7x
topology: tpu7x:2x2x1
jax: 0.10.0
libtpu: 0.0.40
codegen_flags: <defaults>
</compile_context>

<pallas_src>
import functools

import jax
import jax.numpy as jnp
from jax import lax
from jax.experimental import pallas as pl
from jax.experimental.pallas import tpu as pltpu


def _conconv_kernel(x_ref, w_ref, m_ref, o_ref, *, W, K_pad):
    # x_ref: (1, Cin, H*W)      original image, CHW with spatial flattened onto lanes (f32)
    # w_ref: (4*Cout, K_pad)    folded weights (all 4 parities) + bias column + zero pad (bf16)
    # m_ref: (9, H*W)           precomputed 0/1 boundary masks per tap (f32)
    # o_ref: (1, 4*Cout, H*W)   all-parity output slab (f32), lane-dense store
    Cin = x_ref.shape[1]
    L = x_ref.shape[2]  # H * W

    x = x_ref[0]        # keep elementwise work in f32 (v5e VPU has no bf16 VALU)
    m = m_ref[...]      # (9, L) boundary masks, VMEM-resident across grid steps

    # Zero-extend the flattened row so every 3x3 tap offset d = dh*W + dw
    # (d in [-W-1, W+1]) becomes a *static* full-width lane window.
    pad = jnp.zeros((Cin, W + 1), x.dtype)
    x_ext = jnp.concatenate([pad, x, pad], axis=1)  # (Cin, L + 2W + 2)

    pieces = []
    s = 0
    for dh in (-1, 0, 1):
        for dw in (-1, 0, 1):
            off = (W + 1) + dh * W + dw  # static python int
            piece = lax.slice(x_ext, (0, off), (Cin, off + L))  # (Cin, L)
            if dh == 0 and dw == 0:
                pieces.append(piece)               # center tap: never out of bounds
            else:
                pieces.append(piece * m[s:s + 1, :])  # (1,L) mask broadcast over Cin
            s += 1

    tail = [jnp.ones((1, L), x.dtype)]             # bias row (bias folded into w_fold)
    n_zero = K_pad - 9 * Cin - 1
    if n_zero > 0:
        tail.append(jnp.zeros((n_zero, L), x.dtype))  # pad K to bf16 sublane-tile multiple
    rhs = jnp.concatenate(pieces + tail, axis=0).astype(jnp.bfloat16)  # (K_pad, L)

    # One fused matmul for all taps of ALL 4 parities: M = 4*Cout, K = K_pad, lanes = H*W.
    acc = jnp.dot(w_ref[...], rhs, preferred_element_type=jnp.float32)  # (4*Cout, L) f32
    o_ref[0] = acc.astype(o_ref.dtype)


def _build_folded_weights(w_hwio, bias, k_pad):
    # w_hwio: (3, 3, Cin, Cout), bias: (Cout,) -> (4*Cout, k_pad) bf16.
    # For output parity (a, b) (y = 2i+a, x = 2j+b), nearest-x2-upsample + 3x3 'same'
    # conv collapses exactly onto original-grid offsets dh in {a-1, a}, dw in {b-1, b};
    # groups[(a, kh)] lists the 3x3 kernel rows u with floor((a+u-1)/2) == a+kh-1.
    Cin, Cout = w_hwio.shape[2], w_hwio.shape[3]
    groups = {(0, 0): (0,), (0, 1): (1, 2), (1, 0): (0, 1), (1, 1): (2,)}
    parity_rows = []
    for a in range(2):
        for b in range(2):
            slots = [jnp.zeros((Cin, Cout), w_hwio.dtype) for _ in range(9)]
            for kh in range(2):
                for kw in range(2):
                    dh, dw = a + kh - 1, b + kw - 1
                    s = (dh + 1) * 3 + (dw + 1)  # matches kernel's (dh, dw) loop order
                    wsum = jnp.zeros((Cin, Cout), w_hwio.dtype)
                    for u in groups[(a, kh)]:
                        for v in groups[(b, kw)]:
                            wsum = wsum + w_hwio[u, v]
                    slots[s] = wsum
            w_p = jnp.stack(slots, axis=0).reshape(9 * Cin, Cout)  # row = s*Cin + cin
            parity_rows.append(w_p.T)                              # (Cout, 9*Cin)
    w_all = jnp.concatenate(parity_rows, axis=0)                   # (4*Cout, 9*Cin), p-major rows
    bias_col = jnp.tile(bias.reshape(1, Cout), (4, 1)).reshape(4 * Cout, 1)
    cols = [w_all.astype(jnp.float32), bias_col.astype(jnp.float32)]
    n_zero = k_pad - 9 * Cin - 1
    if n_zero > 0:
        cols.append(jnp.zeros((4 * Cout, n_zero), jnp.float32))
    return jnp.concatenate(cols, axis=1).astype(jnp.bfloat16)      # (4*Cout, k_pad)


def _build_boundary_masks(H, W):
    # (9, H*W) 0/1 masks reproducing the zero padding of the (upsampled) conv input.
    idx = jnp.arange(H * W, dtype=jnp.int32)
    i = idx // W
    j = idx - i * W
    rows = []
    for dh in (-1, 0, 1):
        for dw in (-1, 0, 1):
            valid = ((i + dh >= 0) & (i + dh < H) & (j + dw >= 0) & (j + dw < W))
            rows.append(valid.astype(jnp.float32))
    return jnp.stack(rows, axis=0)


def con_conv_generic(x_nchw, w_hwio, bias):
    """forward(x) = Conv2d(3x3, pad=1)(Upsample(x2, nearest)(x)); NCHW in/out."""
    N, Cin, H, W = x_nchw.shape
    Cout = w_hwio.shape[-1]
    L = H * W
    K_pad = ((9 * Cin + 1 + 15) // 16) * 16  # taps + bias row, padded to bf16 tile (16)

    x_flat = x_nchw.reshape(N, Cin, L).astype(jnp.float32)          # free reshape
    w_fold = _build_folded_weights(w_hwio, bias, K_pad)             # (4*Cout, K_pad) bf16
    masks = _build_boundary_masks(H, W)                             # (9, L) f32

    kernel = functools.partial(_conconv_kernel, W=W, K_pad=K_pad)
    out_blk = pl.pallas_call(
        kernel,
        out_shape=jax.ShapeDtypeStruct((N, 4 * Cout, L), jnp.float32),
        grid=(N,),  # one step per batch element; all 4 parities fused in one matmul
        in_specs=[
            pl.BlockSpec((1, Cin, L), lambda n: (n, 0, 0)),
            # constant block index -> weights/masks DMA'd once, stay VMEM-resident
            pl.BlockSpec((4 * Cout, K_pad), lambda n: (0, 0)),
            pl.BlockSpec((9, L), lambda n: (0, 0)),
        ],
        out_specs=pl.BlockSpec((1, 4 * Cout, L), lambda n: (n, 0, 0)),
        compiler_params=pltpu.CompilerParams(
            dimension_semantics=("parallel",)),
    )(x_flat, w_fold, masks)

    # Parity de-interleave (single fused XLA relayout); y = 2i+a, x = 2j+b.
    out = out_blk.reshape(N, 2, 2, Cout, H, W)
    out = jnp.transpose(out, (0, 3, 4, 1, 5, 2)).reshape(N, Cout, 2 * H, 2 * W)
    return out.astype(x_nchw.dtype)  # NCHW


def reference(x_nchw, w_hwio, bias):
    # Pure-JAX reference: nearest x2 upsample then 3x3 'same' conv (matches PyTorch).
    x = jnp.transpose(x_nchw, (0, 2, 3, 1))
    xu = jnp.repeat(jnp.repeat(x, 2, axis=1), 2, axis=2)
    out = lax.conv_general_dilated(
        xu, w_hwio, window_strides=(1, 1), padding="SAME",
        dimension_numbers=("NHWC", "HWIO", "NHWC"),
    )
    out = out + bias
    return jnp.transpose(out, (0, 3, 1, 2))


if __name__ == "__main__":
    key = jax.random.PRNGKey(0)
    kx, kw, kb = jax.random.split(key, 3)

    N, Cin, H, W, Cout = 2, 4, 16, 16, 8
    x = jax.random.normal(kx, (N, Cin, H, W), jnp.float32)
    w = jax.random.normal(kw, (3, 3, Cin, Cout), jnp.float32) * 0.1   # HWIO conv weight
    b = jax.random.normal(kb, (Cout,), jnp.float32) * 0.1

    fwd = jax.jit(con_conv_generic)
    out = fwd(x, w, b)
    out = jax.block_until_ready(out)

    assert out.shape == (N, Cout, 2 * H, 2 * W), out.shape
    ref = reference(x, w, b)
    # Tolerance sized for bf16 matmul operands (f32 accumulation); folding itself is exact.
    if not jnp.allclose(out, ref, atol=2e-2, rtol=2e-2):
        raise AssertionError("Pallas kernel does not match reference")

    print("KERNEL_OK")
</pallas_src>

<mosaic_0001>
module attributes {stable_mosaic.version = 11 : i64} {
  func.func @_conconv_kernel(%arg0: i32, %arg1: memref<1x4x256xf32, #tpu.memory_space<vmem>>, %arg2: memref<32x48xbf16, #tpu.memory_space<vmem>>, %arg3: memref<9x256xf32, #tpu.memory_space<vmem>>, %arg4: memref<1x32x256xf32, #tpu.memory_space<vmem>>) attributes {dimension_semantics = [#tpu.dimension_semantics<parallel>], iteration_bounds = array<i64: 2>, scalar_prefetch = 0 : i64, scratch_operands = 0 : i64, tpu.core_type = #tpu.core_type<tc>, window_params = [{transform_indices = @transform_0, window_bounds = array<i64: 1, 4, 256>}, {pipeline_mode = #tpu.pipeline_mode<synchronous>, transform_indices = @transform_1, window_bounds = array<i64: 32, 48>}, {pipeline_mode = #tpu.pipeline_mode<synchronous>, transform_indices = @transform_2, window_bounds = array<i64: 9, 256>}, {transform_indices = @transform_3, window_bounds = array<i64: 1, 32, 256>}]} {
    %c0 = arith.constant 0 : index
    %c0_0 = arith.constant 0 : index
    %c0_1 = arith.constant 0 : index
    %0 = vector.load %arg1[%c0, %c0_0, %c0_1] : memref<1x4x256xf32, #tpu.memory_space<vmem>>, vector<1x4x256xf32>
    %1 = vector.shape_cast %0 : vector<1x4x256xf32> to vector<4x256xf32>
    %c0_2 = arith.constant 0 : index
    %c0_3 = arith.constant 0 : index
    %2 = vector.load %arg3[%c0_2, %c0_3] : memref<9x256xf32, #tpu.memory_space<vmem>>, vector<9x256xf32>
    %cst = arith.constant 0.000000e+00 : f32
    %3 = vector.broadcast %cst : f32 to vector<4x17xf32>
    %4 = tpu.concatenate %3, %1, %3 in 1 : vector<4x17xf32>, vector<4x256xf32>, vector<4x17xf32> -> vector<4x290xf32>
    %5 = vector.extract_strided_slice %4 {offsets = [0, 0], sizes = [4, 256], strides = [1, 1]} : vector<4x290xf32> to vector<4x256xf32>
    %6 = vector.extract_strided_slice %2 {offsets = [0, 0], sizes = [1, 256], strides = [1, 1]} : vector<9x256xf32> to vector<1x256xf32>
    %7 = vector.broadcast %6 : vector<1x256xf32> to vector<4x256xf32>
    %8 = arith.mulf %5, %7 : vector<4x256xf32>
    %9 = vector.extract_strided_slice %4 {offsets = [0, 1], sizes = [4, 256], strides = [1, 1]} : vector<4x290xf32> to vector<4x256xf32>
    %10 = vector.extract_strided_slice %2 {offsets = [1, 0], sizes = [1, 256], strides = [1, 1]} : vector<9x256xf32> to vector<1x256xf32>
    %11 = vector.broadcast %10 : vector<1x256xf32> to vector<4x256xf32>
    %12 = arith.mulf %9, %11 : vector<4x256xf32>
    %13 = vector.extract_strided_slice %4 {offsets = [0, 2], sizes = [4, 256], strides = [1, 1]} : vector<4x290xf32> to vector<4x256xf32>
    %14 = vector.extract_strided_slice %2 {offsets = [2, 0], sizes = [1, 256], strides = [1, 1]} : vector<9x256xf32> to vector<1x256xf32>
    %15 = vector.broadcast %14 : vector<1x256xf32> to vector<4x256xf32>
    %16 = arith.mulf %13, %15 : vector<4x256xf32>
    %17 = vector.extract_strided_slice %4 {offsets = [0, 16], sizes = [4, 256], strides = [1, 1]} : vector<4x290xf32> to vector<4x256xf32>
    %18 = vector.extract_strided_slice %2 {offsets = [3, 0], sizes = [1, 256], strides = [1, 1]} : vector<9x256xf32> to vector<1x256xf32>
    %19 = vector.broadcast %18 : vector<1x256xf32> to vector<4x256xf32>
    %20 = arith.mulf %17, %19 : vector<4x256xf32>
    %21 = vector.extract_strided_slice %4 {offsets = [0, 17], sizes = [4, 256], strides = [1, 1]} : vector<4x290xf32> to vector<4x256xf32>
    %22 = vector.extract_strided_slice %4 {offsets = [0, 18], sizes = [4, 256], strides = [1, 1]} : vector<4x290xf32> to vector<4x256xf32>
    %23 = vector.extract_strided_slice %2 {offsets = [5, 0], sizes = [1, 256], strides = [1, 1]} : vector<9x256xf32> to vector<1x256xf32>
    %24 = vector.broadcast %23 : vector<1x256xf32> to vector<4x256xf32>
    %25 = arith.mulf %22, %24 : vector<4x256xf32>
    %26 = vector.extract_strided_slice %4 {offsets = [0, 32], sizes = [4, 256], strides = [1, 1]} : vector<4x290xf32> to vector<4x256xf32>
    %27 = vector.extract_strided_slice %2 {offsets = [6, 0], sizes = [1, 256], strides = [1, 1]} : vector<9x256xf32> to vector<1x256xf32>
    %28 = vector.broadcast %27 : vector<1x256xf32> to vector<4x256xf32>
    %29 = arith.mulf %26, %28 : vector<4x256xf32>
    %30 = vector.extract_strided_slice %4 {offsets = [0, 33], sizes = [4, 256], strides = [1, 1]} : vector<4x290xf32> to vector<4x256xf32>
    %31 = vector.extract_strided_slice %2 {offsets = [7, 0], sizes = [1, 256], strides = [1, 1]} : vector<9x256xf32> to vector<1x256xf32>
    %32 = vector.broadcast %31 : vector<1x256xf32> to vector<4x256xf32>
    %33 = arith.mulf %30, %32 : vector<4x256xf32>
    %34 = vector.extract_strided_slice %4 {offsets = [0, 34], sizes = [4, 256], strides = [1, 1]} : vector<4x290xf32> to vector<4x256xf32>
    %35 = vector.extract_strided_slice %2 {offsets = [8, 0], sizes = [1, 256], strides = [1, 1]} : vector<9x256xf32> to vector<1x256xf32>
    %36 = vector.broadcast %35 : vector<1x256xf32> to vector<4x256xf32>
    %37 = arith.mulf %34, %36 : vector<4x256xf32>
    %cst_4 = arith.constant 1.000000e+00 : f32
    %38 = vector.broadcast %cst_4 : f32 to vector<1x256xf32>
    %cst_5 = arith.constant 0.000000e+00 : f32
    %39 = vector.broadcast %cst_5 : f32 to vector<11x256xf32>
    %40 = tpu.concatenate %8, %12, %16, %20, %21, %25, %29, %33, %37, %38, %39 in 0 : vector<4x256xf32>, vector<4x256xf32>, vector<4x256xf32>, vector<4x256xf32>, vector<4x256xf32>, vector<4x256xf32>, vector<4x256xf32>, vector<4x256xf32>, vector<4x256xf32>, vector<1x256xf32>, vector<11x256xf32> -> vector<48x256xf32>
    %41 = arith.truncf %40 : vector<48x256xf32> to vector<48x256xbf16>
    %c0_6 = arith.constant 0 : index
    %c0_7 = arith.constant 0 : index
    %42 = vector.load %arg2[%c0_6, %c0_7] : memref<32x48xbf16, #tpu.memory_space<vmem>>, vector<32x48xbf16>
    %cst_8 = arith.constant dense<0.000000e+00> : vector<32x256xf32>
    %43 = tpu.matmul %42, %41, %cst_8 {dimension_numbers = #tpu.dot_dimension_numbers<[1], [0], [0], [1], [0, 0, 1, 1], [], []>} : vector<32x48xbf16>, vector<48x256xbf16>, vector<32x256xf32> -> vector<32x256xf32>
    %c0_9 = arith.constant 0 : index
    %c0_10 = arith.constant 0 : index
    %c0_11 = arith.constant 0 : index
    %44 = vector.load %arg4[%c0_9, %c0_10, %c0_11] : memref<1x32x256xf32, #tpu.memory_space<vmem>>, vector<1x32x256xf32>
    %45 = vector.shape_cast %44 : vector<1x32x256xf32> to vector<32x256xf32>
    %46 = vector.shape_cast %43 : vector<32x256xf32> to vector<1x32x256xf32>
    tpu.vector_store %arg4[%c0_9, %c0_10, %c0_11], %46 {strides = array<i32>} : memref<1x32x256xf32, #tpu.memory_space<vmem>>, vector<1x32x256xf32>,
    return
  }
  func.func @transform_0(%arg0: i32) -> (i32, i32, i32) {
    %c0_i32 = arith.constant 0 : i32
    %c0_i32_0 = arith.constant 0 : i32
    %c0_i32_1 = arith.constant 0 : i32
    return %arg0, %c0_i32, %c0_i32_0 : i32, i32, i32
  }
  func.func @transform_1(%arg0: i32) -> (i32, i32) {
    %c0_i32 = arith.constant 0 : i32
    %c0_i32_0 = arith.constant 0 : i32
    %c0_i32_1 = arith.constant 0 : i32
    return %c0_i32, %c0_i32_0 : i32, i32
  }
  func.func @transform_2(%arg0: i32) -> (i32, i32) {
    %c0_i32 = arith.constant 0 : i32
    %c0_i32_0 = arith.constant 0 : i32
    %c0_i32_1 = arith.constant 0 : i32
    return %c0_i32, %c0_i32_0 : i32, i32
  }
  func.func @transform_3(%arg0: i32) -> (i32, i32, i32) {
    %c0_i32 = arith.constant 0 : i32
    %c0_i32_0 = arith.constant 0 : i32
    %c0_i32_1 = arith.constant 0 : i32
    return %arg0, %c0_i32, %c0_i32_0 : i32, i32, i32
  }
}

</mosaic_0001>

<bundles_post_ra>
// kernel: tile.1
= control target key start
LH: loop header
LB: loop body
LE: loop exit
PB: predicated region body
PF: predicated region fallthrough
CT: control target
= control target key end

     0   :  { %s115_s8 = smov 125   ;;  %vm19_vm0 = vcmask 7168   ;;  %s116_s9 = smov 126   ;;  %s148_s0 = inlined_call_operand.vmem [shape: bf16[4,1,1,8], index: 0, kind: input, shape index: {}]   ;;  %s149_s1 = inlined_call_operand.vmem [shape: bf16[32,1], index: 1, kind: output, shape index: {}]  }
   0x1   :  { %v14_v0 = vld [vmem:[%s148_s0] sm:$0x3]  ;;  %s114_s0 = smov 127   ;;  %s117_s10 = smov 124  }
   0x2   :  { %v15_v1 = vunpack.c.l.bf16 %v14_v0  ;;  %s118_s11 = smov 123   ;;  %s119_s12 = smov 122  }
   0x3   :  { %s120_s13 = smov 121  }
   0x4   :  { %17 = vst [vmem:[#allocation1] sm:$0xf] %v15_v1 }
   0xb   :  { %v21_v2 = vld [vmem:[#allocation1] sm:$0xf]  }
   0xc   :  { %v33_v3 = vld [vmem:[#allocation1] sm:$0xf]   ;;  %22 = vrot.lane.b32.xlu0 %v21_v2, %s114_s0 }
   0xd   :  { %34 = vrot.lane.b32.xlu1 %v33_v3, %s115_s8  ;;  %v27_v4 = vld [vmem:[#allocation1] sm:$0xf]  }
   0xe   :  { %v39_v5 = vld [vmem:[#allocation1] sm:$0xf]  }
   0xf   :  { %v18_v6 = vld [vmem:[#allocation1] sm:$0xf]  }
  0x10   :  { %20 = vst.msk [vmem:[#allocation0] ss:$8 sm:$0xf] %vm19_vm0, %v18_v6   ;;  %28 = vrot.lane.b32.xlu0 %v27_v4, %s116_s9  ;;  %v45_v7 = vld [vmem:[#allocation1] sm:$0xf]  }
  0x11   :  { %40 = vrot.lane.b32.xlu1 %v39_v5, %s117_s10  ;;  %v51_v8 = vld [vmem:[#allocation1] sm:$0xf]  }
  0x12   :  { %v57_v9 = vld [vmem:[#allocation1] sm:$0xf]  }
  0x14   :  { %46 = vrot.lane.b32.xlu0 %v45_v7, %s118_s11 }
  0x15   :  { %52 = vrot.lane.b32.xlu1 %v51_v8, %s119_s12 }
  0x18   :  { %58 = vrot.lane.b32.xlu0 %v57_v9, %s120_s13 }
  0x7e   :  { %v23_v10 = vpop.permute.xlu0 %22  }
  0x7f   :  { %v35_v11 = vpop.permute.xlu1 %34   ;;  %26 = vst.msk [vmem:[#allocation0 + $0x1] ss:$8 sm:$0xf] %vm19_vm0, %v23_v10  }
  0x80   :  { %38 = vst.msk [vmem:[#allocation0 + $0x3] ss:$8 sm:$0xf] %vm19_vm0, %v35_v11  }
  0x82   :  { %v29_v12 = vpop.permute.xlu0 %28  }
  0x83   :  { %v41_v13 = vpop.permute.xlu1 %40   ;;  %32 = vst.msk [vmem:[#allocation0 + $0x2] ss:$8 sm:$0xf] %vm19_vm0, %v29_v12  }
  0x84   :  { %44 = vst.msk [vmem:[#allocation0 + $0x4] ss:$8 sm:$0xf] %vm19_vm0, %v41_v13  }
  0x86   :  { %v47_v14 = vpop.permute.xlu0 %46  }
  0x87   :  { %v53_v15 = vpop.permute.xlu1 %52   ;;  %50 = vst.msk [vmem:[#allocation0 + $0x5] ss:$8 sm:$0xf] %vm19_vm0, %v47_v14  }
  0x88   :  { %56 = vst.msk [vmem:[#allocation0 + $0x6] ss:$8 sm:$0xf] %vm19_vm0, %v53_v15  }
  0x8a   :  { %v59_v16 = vpop.permute.xlu0 %58  }
  0x8b   :  { %62 = vst.msk [vmem:[#allocation0 + $0x7] ss:$8 sm:$0xf] %vm19_vm0, %v59_v16  }
  0x92   :  { %v67_v17 = vld [vmem:[#allocation0] sm:$0xff]  ;;  %v72_v18 = vld [vmem:[#allocation0 + $0x8] sm:$0xff]  ;;  %v78_v19 = vld [vmem:[#allocation0 + $0x10] sm:$0xff] }
  0x93   :  { %v99_v20 = vpack.c.bf16 %v72_v18, %v67_v17  ;;  %v85_v21 = vld [vmem:[#allocation0 + $0x18] sm:$0xff] }
  0x94   :  { %v104_v22 = vpack.c.bf16 %v85_v21, %v78_v19 }
  0x95   :  { %100 = vst [vmem:[%s149_s1] sm:$0xff] %v99_v20  }
  0x96   :  { %106 = vst [vmem:[%s149_s1 + $0x8] sm:$0xff] %v104_v22  }

// kernel: con_conv_generic.1
= control target key start
LH: loop header
LB: loop body
LE: loop exit
PB: predicated region body
PF: predicated region fallthrough
CT: control target
= control target key end

     0   :  { %s782_s12 = smov 0   ;;  %s886_s0 = inlined_call_operand.vmem [shape: f32[2,4,256], index: 0, kind: input, shape index: {}]   ;;  %s887_s1 = inlined_call_operand.vmem [shape: bf16[32,48], index: 1, kind: input, shape index: {}]   ;;  %s888_s2 = inlined_call_operand.vmem [shape: f32[9,256], index: 2, kind: input, shape index: {}]   ;;  %s889_s3 = inlined_call_operand.vmem [shape: f32[2,32,256], index: 3, kind: output, shape index: {}]  }
   0x1 LB: > { %s634_s13 = sadd.s32 4294967295, %s741_s12   ;;  %p638_p0 = scmp.ge.s32.totalorder %s741_s12, 1  ;;  %s741_s12 = sphi %s782_s12, %s13_s12  }
   0x2   : > { %p137_p1 = scmp.lt.s32.totalorder %s741_s12, 3 }
   0x4   : > { %p138_p2 = pnand %p638_p0, %p137_p1 }
   0x5   : > { %p161_p3 = scmp.lt.s32.totalorder (!%p138_p2), %s634_s13, 1  ;;  %v190_v0 = vlaneseq (!%p138_p2)  ;;  %v173_v2 = vld [vmem:[%s888_s2] sm:$0xff] (!%p138_p2)  ;;  %v174_v5 = vld [vmem:[%s888_s2 + $0x8] sm:$0xff] (!%p138_p2)  ;;  %s743_s22 = smov (!%p138_p2), 17   ;;  %v643_v27 = vld [vmem:[%s888_s2 + $0x10] ss:$0 sm:$0xff] (!%p138_p2) }
   0x6   : > { %141 = sbr.rel (%p138_p2) target bundleno = 518 (0x206), region = 32  ;;  %s744_s23 = smov (!%p138_p2), 1   ;;  %v644_v28 = vld [vmem:[%s888_s2 + $0x18] ss:$0 sm:$0xff] (!%p138_p2)  ;;  %vm183_vm0 = vcmask (!%p138_p2), 138240   ;;  %vm236_vm1 = vcmask (!%p138_p2), 15360  }
   0x7   : > { %v191_v1 = vshrl.u32 (!%p138_p2), %v190_v0, 7  ;;  %s745_s24 = smov (!%p138_p2), 16   ;;  %s746_s25 = smov (!%p138_p2), 2   ;;  %vm280_vm2 = vcmask (!%p138_p2), 146432   ;;  %vm214_vm3 = vcmask (!%p138_p2), 7168   ;;  %vm258_vm4 = vcmask (!%p138_p2), 130048  }
   0x8   : > { %s747_s26 = smov (!%p138_p2), 18   ;;  %s748_s27 = smov (!%p138_p2), 33   ;;  %vm324_vm5 = vcmask (!%p138_p2), 269312   ;;  %vm302_vm6 = vcmask (!%p138_p2), 261120   ;;  %vm346_vm7 = vcmask (!%p138_p2), 277504   ;;  %vm410_vm8 = vcmask (!%p138_p2), 908288  }
   0x9   : > { %v202_v3 = vsub.s32 (!%p138_p2), 1, %v191_v1  ;;  %v246_v4 = vsub.s32 (!%p138_p2), 3, %v191_v1  ;;  %v192_v6 = vsub.s32 (!%p138_p2), 0, %v191_v1  ;;  %v224_v14 = vsub.s32 (!%p138_p2), 2, %v191_v1  ;;  %s749_s28 = smov (!%p138_p2), 32   ;;  %s750_s6 = smov (!%p138_p2), 34  }
   0xa   : > { %v268_v17 = vsub.s32 (!%p138_p2), 5, %v191_v1  ;;  %v312_v20 = vsub.s32 (!%p138_p2), 7, %v191_v1  ;;  %v290_v23 = vsub.s32 (!%p138_p2), 6, %v191_v1  ;;  %s751_s7 = smov (!%p138_p2), 111   ;;  %s752_s8 = smov (!%p138_p2), 126   ;;  %vm366_vm9 = vcmask (!%p138_p2), 1039360  }
   0xb   : > { %v203_v8 = vrot.slane (!%p138_p2), %v173_v2, %v202_v3  ;;  %v247_v9 = vrot.slane (!%p138_p2), %v173_v2, %v246_v4  ;;  %v207_v10 = vrot.slane (!%p138_p2), %v174_v5, %v202_v3  ;;  %v197_v11 = vrot.slane (!%p138_p2), %v174_v5, %v192_v6  ;;  %s753_s9 = smov (!%p138_p2), 127   ;;  %s754_s10 = smov (!%p138_p2), 112  }
   0xc   : > { %v193_v12 = vrot.slane (!%p138_p2), %v173_v2, %v192_v6  ;;  %v251_v15 = vrot.slane (!%p138_p2), %v174_v5, %v246_v4  ;;  %v225_v16 = vrot.slane (!%p138_p2), %v173_v2, %v224_v14  ;;  %v229_v18 = vrot.slane (!%p138_p2), %v174_v5, %v224_v14  ;;  %s755_s11 = smov (!%p138_p2), 110   ;;  %s756_s14 = smov (!%p138_p2), 96  }
   0xd   : > { %s891_s13 = smov (!%p161_p3, %s634_s13), 1  ;;  %210 = vrot.lane.b32.xlu1 %v203_v8, %s744_s23  ;;  %v269_v19 = vrot.slane %v173_v2, %v268_v17  ;;  %v273_v21 = vrot.slane %v174_v5, %v268_v17  ;;  %v313_v22 = vrot.slane %v173_v2, %v312_v20  ;;  %v317_v24 = vrot.slane %v174_v5, %v312_v20  ;;  %s757_s15 = smov 95  }
   0xe   : > { %s657_s16 = sshll.u32 %s891_s13, 3  ;;  %v291_v25 = vrot.slane %v173_v2, %v290_v23  ;;  %v295_v26 = vrot.slane %v174_v5, %v290_v23  ;;  %vm380_vm10 = vcmask 1031168   ;;  %vm427_vm11 = vcmask 900096   ;;  %s658_s21 = sshll.u32 %s891_s13, 6 }
   0xf   : > { %s165_s19 = scalar_lea.vmem %s886_s0, %s657_s16  ;;  %s759_s16 = smov 94   ;;  %vm458_vm12 = vcmask 777216   ;;  %vm441_vm13 = vcmask 785408   ;;  %vm477_vm14 = vcmask 1043456   ;;  %vm397_vm15 = vcmask 916480  }
  0x10   : > { %v172_v7 = vld [vmem:[%s165_s19] sm:$0xff] }
  0x11   : > { %179 = vrot.lane.b32.xlu0 %v172_v7, %s743_s22  ;;  %v178_v13 = vcombine.high %v172_v7, %v172_v7  ;;  %212 = vrot.lane.b32.xlu1 %v207_v10, %s744_s23 }
  0x15   : > { %254 = vrot.lane.b32.xlu0 %v247_v9, %s745_s24  ;;  %256 = vrot.lane.b32.xlu1 %v251_v15, %s745_s24  ;;  %s170_s24 = scalar_lea.vmem %s889_s3, %s658_s21 }
  0x19   : > { %181 = vrot.lane.b32.xlu0 %v178_v13, %s743_s22  ;;  %234 = vrot.lane.b32.xlu1 %v229_v18, %s746_s25 }
  0x1d   : > { %232 = vrot.lane.b32.xlu0 %v225_v16, %s746_s25  ;;  %278 = vrot.lane.b32.xlu1 %v273_v21, %s747_s26 }
  0x21   : > { %276 = vrot.lane.b32.xlu0 %v269_v19, %s747_s26  ;;  %322 = vrot.lane.b32.xlu1 %v317_v24, %s748_s27 }
  0x25   : > { %320 = vrot.lane.b32.xlu0 %v313_v22, %s748_s27  ;;  %300 = vrot.lane.b32.xlu1 %v295_v26, %s749_s28 }
  0x29   : > { %298 = vrot.lane.b32.xlu0 %v291_v25, %s749_s28  ;;  %344 = vrot.lane.b32.xlu1 %v644_v28, %s750_s6 }
  0x2d   : > { %342 = vrot.lane.b32.xlu0 %v643_v27, %s750_s6 }
  0x7f   : > { %v211_v31 = vpop.permute.xlu1 %210 }
  0x83   : > { %v180_v29 = vpop.permute.xlu0 %179  ;;  %v213_v34 = vpop.permute.xlu1 %212 }
  0x84   : > { %v808_v30 = vsel %vm183_vm0, 0.0, %v180_v29  ;;  %v215_v56 = vsel %vm214_vm3, %v211_v31, %v213_v34 }
  0x85   : > { %404 = vrot.lane.b32.xlu0 %v808_v30, %s751_s7  ;;  %v812_v32 = vmul.f32 %v193_v12, %v808_v30  ;;  %v219_v47 = vmul.f32 %v211_v31, %v808_v30 }
  0x87   : > { %v255_v33 = vpop.permute.xlu0 %254  ;;  %v257_v37 = vpop.permute.xlu1 %256  ;;  %v357_v52 = vrot.slane %v219_v47, 4 }
  0x88   : > { %v263_v53 = vmul.f32 %v255_v33, %v808_v30  ;;  %v259_v57 = vsel %vm258_vm4, %v255_v33, %v257_v37  ;;  %vm511_vm4 = vcmask 392192  }
  0x8a   : > { %v388_v63 = vrot.slane %v263_v53, 4 }
  0x8b   : > { %v182_v35 = vpop.permute.xlu0 %181  ;;  %v235_v42 = vpop.permute.xlu1 %234 }
  0x8c   : > { %v814_v36 = vsel %vm183_vm0, %v180_v29, %v182_v35  ;;  %v819_v40 = vsel %vm183_vm0, %v182_v35, 0.0  ;;  %vm472_vm0 = vcmask 769024  }
  0x8d   : > { %v817_v38 = vmul.f32 %v197_v11, %v814_v36  ;;  %v243_v44 = vmul.f32 %v235_v42, %v819_v40  ;;  %v692_v50 = vpack.i.bf16 %v819_v40, %v814_v36  ;;  %v220_v61 = vmul.f32 %v215_v56, %v814_v36 }
  0x8e   : > { %v221_v62 = vmul.f32 %v213_v34, %v819_v40  ;;  %v264_v5 = vmul.f32 %v259_v57, %v814_v36  ;;  %v265_v6 = vmul.f32 %v257_v37, %v819_v40  ;;  %v758_v34 = vmov 0  }
  0x8f   : > { %v233_v39 = vpop.permute.xlu0 %232  ;;  %v279_v49 = vpop.permute.xlu1 %278  ;;  %v358_v10 = vrot.slane %v220_v61, 4  ;;  %550 = vmatprep.mubr.bf16.mxu0 %v758_v34  ;;  %560 = vmatprep.mubr.bf16.mxu1 %v758_v34 }
  0x90   : > { %v241_v41 = vmul.f32 %v233_v39, %v808_v30  ;;  %v237_v43 = vsel %vm236_vm1, %v233_v39, %v235_v42  ;;  %v287_v59 = vmul.f32 %v279_v49, %v819_v40  ;;  %v359_v11 = vrot.slane %v221_v62, 4 }
  0x91   : > { %v242_v45 = vmul.f32 %v237_v43, %v814_v36  ;;  %v389_v16 = vrot.slane %v264_v5, 4  ;;  %v390_v17 = vrot.slane %v265_v6, 4  ;;  %vm488_vm1 = vcmask 1044480  }
  0x92   : > { %374 = vrot.lane.b32.xlu0 %v241_v41, %s752_s8  ;;  %v420_v9 = vrot.slane %v287_v59, 4  ;;  %v707_v21 = vpack.i.bf16 %v359_v11, %v358_v10 }
  0x93   : > { %v277_v46 = vpop.permute.xlu0 %276  ;;  %v697_v48 = vpack.i.bf16 %v243_v44, %v242_v45  ;;  %v323_v54 = vpop.permute.xlu1 %322  ;;  %v712_v26 = vpack.i.bf16 %v390_v17, %v389_v16 }
  0x94   : > { %v281_v55 = vsel %vm280_vm2, %v277_v46, %v279_v49  ;;  %v285_v58 = vmul.f32 %v277_v46, %v808_v30  ;;  %v331_v14 = vmul.f32 %v323_v54, %v819_v40  ;;  %vm760_vm2 = vmmov 1  }
  0x95   : > { %698 = vrot.lane.b32.xlu1 %v697_v48, %s752_s8  ;;  %v286_v0 = vmul.f32 %v281_v55, %v814_v36  ;;  %vm647_vm3 = vmpackc.low %vm760_vm2, %vm488_vm1 }
  0x96   : > { %693 = vrot.lane.b32.xlu0 %v692_v50, %s751_s7  ;;  %v418_v8 = vrot.slane %v285_v58, 4  ;;  %v451_v19 = vrot.slane %v331_v14, 4 }
  0x97   : > { %v321_v51 = vpop.permute.xlu0 %320  ;;  %v301_v1 = vpop.permute.xlu1 %300  ;;  %v419_v12 = vrot.slane %v286_v0, 4 }
  0x98   : > { %v325_v2 = vsel %vm324_vm5, %v321_v51, %v323_v54  ;;  %v309_v4 = vmul.f32 %v301_v1, %v819_v40  ;;  %v329_v24 = vmul.f32 %v321_v51, %v808_v30 }
  0x99   : > { %360 = vrot.lane.b32.xlu1 %v357_v52, %s753_s9  ;;  %v330_v13 = vmul.f32 %v325_v2, %v814_v36  ;;  %v717_v20 = vpack.i.bf16 %v420_v9, %v419_v12 }
  0x9a   : > { %v449_v28 = vrot.slane %v329_v24, 4 }
  0x9b   : > { %v299_v60 = vpop.permute.xlu0 %298  ;;  %v450_v18 = vrot.slane %v330_v13, 4  ;;  %v345_v23 = vpop.permute.xlu1 %344 }
  0x9c   : > { %v303_v3 = vsel %vm302_vm6, %v299_v60, %v301_v1  ;;  %v307_v29 = vmul.f32 %v299_v60, %v808_v30  ;;  %v353_v33 = vmul.f32 %v345_v23, %v819_v40 }
  0x9d   : > { %v308_v7 = vmul.f32 %v303_v3, %v814_v36  ;;  %391 = vrot.lane.b32.xlu1 %v388_v63, %s754_s10  ;;  %v722_v25 = vpack.i.bf16 %v451_v19, %v450_v18 }
  0x9f   : > { %v702_v15 = vpack.i.bf16 %v309_v4, %v308_v7  ;;  %v343_v22 = vpop.permute.xlu0 %342 }
  0xa0   : > { %v347_v27 = vsel %vm346_vm7, %v343_v22, %v345_v23  ;;  %v351_v35 = vmul.f32 %v343_v22, %v808_v30 }
  0xa1   : > { %421 = vrot.lane.b32.xlu1 %v418_v8, %s755_s11  ;;  %703 = vrot.lane.b32.xlu0 %v702_v15, %s756_s14  ;;  %v352_v31 = vmul.f32 %v347_v27, %v814_v36 }
  0xa3   : > { %v727_v37 = vpack.i.bf16 %v353_v33, %v352_v31 }
  0xa5   : > { %718 = vrot.lane.b32.xlu1 %v717_v20, %s755_s11  ;;  %708 = vrot.lane.b32.xlu0 %v707_v21, %s753_s9 }
  0xa9   : > { %723 = vrot.lane.b32.xlu1 %v722_v25, %s757_s15  ;;  %713 = vrot.lane.b32.xlu0 %v712_v26, %s754_s10 }
  0xad   : > { %452 = vrot.lane.b32.xlu1 %v449_v28, %s757_s15  ;;  %435 = vrot.lane.b32.xlu0 %v307_v29, %s756_s14 }
  0xb1   : > { %466 = vrot.lane.b32.xlu1 %v351_v35, %s759_s16  ;;  %728 = vrot.lane.b32.xlu0 %v727_v37, %s759_s16  ;;  %v761_v35 = vmov 0.0  }
  0xf7   : > { %v405_v39 = vpop.permute.xlu0 %404 }
 0x104   : > { %v375_v42 = vpop.permute.xlu0 %374 }
 0x107   : > { %v699_v41 = vpop.permute.xlu1 %698 }
 0x108   : > { %v694_v44 = vpop.permute.xlu0 %693  ;;  %v701_v30 = vunpack.i.h.bf16 %v699_v41  ;;  %v700_v50 = vunpack.i.l.bf16 %v699_v41  ;;  %v733_v41 = vld [vmem:[%s887_s1] sm:$0xff]  }
 0x109   : > { %v696_v40 = vunpack.i.h.bf16 %v694_v44  ;;  %v695_v47 = vunpack.i.l.bf16 %v694_v44 }
 0x10a   : > { %v382_v4 = vsel %vm380_vm10, %v700_v50, %v701_v30  ;;  %v381_v5 = vsel %vm380_vm10, %v375_v42, %v700_v50  ;;  %v734_v42 = vld [vmem:[%s887_s1 + $0x8] sm:$0xff]  }
 0x10b   : > { %v361_v43 = vpop.permute.xlu1 %360  ;;  %v412_v57 = vsel %vm410_vm8, %v695_v47, %v696_v40 }
 0x10f   : > { %v392_v45 = vpop.permute.xlu1 %391 }
 0x113   : > { %v422_v36 = vpop.permute.xlu1 %421  ;;  %v704_v46 = vpop.permute.xlu0 %703 }
 0x114   : > { %v706_v53 = vunpack.i.h.bf16 %v704_v46  ;;  %v705_v54 = vunpack.i.l.bf16 %v704_v46 }
 0x116   : > { %v443_v3 = vsel %vm441_vm13, %v705_v54, %v706_v53 }
 0x117   : > { %v719_v48 = vpop.permute.xlu1 %718  ;;  %v709_v49 = vpop.permute.xlu0 %708 }
 0x118   : > { %v711_v51 = vunpack.i.h.bf16 %v709_v49  ;;  %v710_v52 = vunpack.i.l.bf16 %v709_v49  ;;  %v721_v55 = vunpack.i.h.bf16 %v719_v48  ;;  %v720_v56 = vunpack.i.l.bf16 %v719_v48 }
 0x11a   : > { %v368_v60 = vsel %vm366_vm9, %v710_v52, %v711_v51  ;;  %v367_v61 = vsel %vm366_vm9, %v361_v43, %v710_v52  ;;  %v429_v2 = vsel %vm427_vm11, %v720_v56, %v721_v55 }
 0x11b   : > { %v724_v58 = vpop.permute.xlu1 %723  ;;  %v714_v59 = vpop.permute.xlu0 %713  ;;  %v479_v8 = vsel %vm477_vm14, %v817_v38, %v368_v60  ;;  %v478_v13 = vsel %vm477_vm14, %v812_v32, %v367_v61  ;;  %v428_v38 = vsel %vm427_vm11, %v422_v36, %v720_v56  ;;  %v483_v20 = vsel %vm477_vm14, %v412_v57, %v429_v2 }
 0x11c   : > { %v726_v62 = vunpack.i.h.bf16 %v724_v58  ;;  %v725_v63 = vunpack.i.l.bf16 %v724_v58  ;;  %v716_v0 = vunpack.i.h.bf16 %v714_v59  ;;  %v715_v1 = vunpack.i.l.bf16 %v714_v59 }
 0x11d   : > { %v411_v32 = vsel %vm410_vm8, %v405_v39, %v695_v47 }
 0x11e   : > { %v460_v6 = vsel %vm458_vm12, %v725_v63, %v726_v62  ;;  %v399_v7 = vsel %vm397_vm15, %v715_v1, %v716_v0  ;;  %v398_v9 = vsel %vm397_vm15, %v392_v45, %v715_v1  ;;  %v482_v26 = vsel %vm477_vm14, %v411_v32, %v428_v38 }
 0x11f   : > { %v453_v10 = vpop.permute.xlu1 %452  ;;  %v436_v11 = vpop.permute.xlu0 %435  ;;  %v481_v12 = vsel %vm477_vm14, %v382_v4, %v399_v7  ;;  %v480_v14 = vsel %vm477_vm14, %v381_v5, %v398_v9  ;;  %v485_v15 = vsel %vm477_vm14, %v443_v3, %v460_v6 }
 0x120   : > { %v459_v16 = vsel %vm458_vm12, %v453_v10, %v725_v63  ;;  %v442_v17 = vsel %vm441_vm13, %v436_v11, %v705_v54  ;;  %v492_v18 = vpack.c.bf16 %v481_v12, %v479_v8  ;;  %v491_v19 = vpack.c.bf16 %v480_v14, %v478_v13 }
 0x121   : > { %v484_v21 = vsel %vm477_vm14, %v442_v17, %v459_v16  ;;  %v494_v22 = vpack.c.bf16 %v485_v15, %v483_v20 }
 0x122   : > { %518 = vmatprep.subr.bf16.mxu0 %v492_v18  ;;  %659 = vmatprep.subr.bf16.mxu1 %v492_v18  ;;  %v493_v28 = vpack.c.bf16 %v484_v21, %v482_v26 }
 0x123   : > { %v729_v23 = vpop.permute.xlu0 %728  ;;  %519 = vmatpush1.bf16.msra.mxu0 %v491_v19  ;;  %662 = vmatpush1.bf16.msra.mxu1 %v491_v19  ;;  %v467_v27 = vpop.permute.xlu1 %466 }
 0x124   : > { %v731_v24 = vunpack.i.h.bf16 %v729_v23  ;;  %v730_v25 = vunpack.i.l.bf16 %v729_v23  ;;  %520 = vmatprep.subr.bf16.mxu0 %v494_v22  ;;  %660 = vmatprep.subr.bf16.mxu1 %v494_v22 }
 0x126   : > { %v473_v29 = vsel %vm472_vm0, %v467_v27, %v730_v25  ;;  %v474_v31 = vsel %vm472_vm0, %v730_v25, %v731_v24 }
 0x127   : > { %v486_v33 = vsel %vm477_vm14, %v473_v29, 1.0  ;;  %v487_v34 = vsel %vm477_vm14, %v474_v31, 1.0  ;;  %521 = vmatpush1.bf16.msra.mxu0 %v493_v28  ;;  %663 = vmatpush1.bf16.msra.mxu1 %v493_v28 }
 0x128   : > { %v648_v37 = vpack.c.bf16 %v761_v35, %v487_v34  ;;  %v651_v39 = vpack.c.bf16 %v761_v35, %v486_v33 }
 0x12a   : > { %649 = vmatprep.subr.msk.bf16.mxu0 %vm647_vm3, %v648_v37  ;;  %661 = vmatprep.subr.msk.bf16.mxu1 %vm647_vm3, %v648_v37 }
 0x12b   : > { %652 = vmatpush1.bf16.msk.msra.mxu0 %vm647_vm3, %v651_v39  ;;  %664 = vmatpush1.bf16.msk.msra.mxu1 %vm647_vm3, %v651_v39 }
 0x12e   : > { %653 = vmatmul.mubr.msk.bf16.vlgmr.msra.gmra.mrb[0].mxu0 %vm511_vm4, %v733_v41  ;;  %654 = vmatmul.mubr.msk.bf16.vlgmr.msra.gmra.mrb[0].mxu1 %vm511_vm4, %v734_v42 }
 0x201   : > { %v552_v43 = vpop.f32.mrb[0].mxu0  ;;  %v562_v44 = vpop.f32.mrb[0].mxu1 }
 0x202   : > { %571 = vst [vmem:[%s170_s24] sm:$0xff] %v552_v43  ;;  %575 = vst [vmem:[%s170_s24 + $0x20] sm:$0xff] %v562_v44  ;;  %v554_v45 = vpop.f32.mrb[1].mxu0  ;;  %v564_v36 = vpop.f32.mrb[1].mxu1 }
 0x203   : > { %572 = vst [vmem:[%s170_s24 + $0x8] sm:$0xff] %v554_v45  ;;  %576 = vst [vmem:[%s170_s24 + $0x28] sm:$0xff] %v564_v36  ;;  %v556_v46 = vpop.f32.mrb[2].mxu0  ;;  %v566_v40 = vpop.f32.mrb[2].mxu1 }
 0x204   : > { %573 = vst [vmem:[%s170_s24 + $0x10] sm:$0xff] %v556_v46  ;;  %577 = vst [vmem:[%s170_s24 + $0x30] sm:$0xff] %v566_v40  ;;  %v558_v47 = vpop.f32.mrb[3].mxu0  ;;  %v568_v48 = vpop.f32.mrb[3].mxu1 }
 0x205   : > { %574 = vst [vmem:[%s170_s24 + $0x18] sm:$0xff] %v558_v47  ;;  %578 = vst [vmem:[%s170_s24 + $0x38] sm:$0xff] %v568_v48 }
 0x206 PF: > { %s13_s12 = sadd.s32 1, %s741_s12  }
 0x207   : > { %p10_p4 = scmp.ge.s32.totalorder %s13_s12, 4  }
 0x209   :  { %12 = sbr.rel (!%p10_p4) target bundleno = 1 (0x1), region = 62 }

</bundles_post_ra>
